<compile_context>
chip_gen: v7x
topology: tpu7x:2x2x1
jax: 0.10.0
libtpu: 0.0.40
codegen_flags: <defaults>
</compile_context>

<pallas_src>
import functools
import math

import jax
import jax.numpy as jnp
from jax.experimental import pallas as pl
from jax.experimental.pallas import tpu as pltpu


def build_pe_table(d_model: int, max_len: int = 5000) -> jnp.ndarray:
    """Deterministic sinusoidal positional-encoding table (max_len, d_model)."""
    position = jnp.arange(0, max_len, dtype=jnp.float32)[:, None]            # (L, 1)
    div_term = jnp.exp(
        jnp.arange(0, d_model, 2, dtype=jnp.float32) * (-math.log(10000.0) / d_model)
    )                                                                         # (D/2,)
    pe = jnp.zeros((max_len, d_model), dtype=jnp.float32)
    pe = pe.at[:, 0::2].set(jnp.sin(position * div_term))
    pe = pe.at[:, 1::2].set(jnp.cos(position * div_term))
    return pe


def _pe_kernel(scale, x_ref, pe_ref, o_ref):
    # `scale` is a Python float closure constant -> folds into the vmul path.
    # Single VPU mul+add over the tile; pe broadcasts over sublanes on the
    # flattened path. Store cast is a no-op when dtypes already match.
    o_ref[...] = (x_ref[...] * scale + pe_ref[...]).astype(o_ref.dtype)


# Per-block VMEM budget (x / out / pe blocks each). 4 MiB blocks keep the
# total (double-buffered x + out + pe) around ~24-30 MiB, which fits every
# generation's physical VMEM (incl. v7x's 64 MiB) with the explicit
# vmem_limit_bytes below, while blocks stay big enough to sit near the HBM
# roofline (~85% needs >=512-wide tiles; per-step overhead ~0.35 us).
_BLOCK_BUDGET_BYTES = 4 * 1024 * 1024


def _sublane_multiple(dtype) -> int:
    """Min legal second-to-last block multiple: 8 (f32), 16 (bf16), 32 (i8/fp8)."""
    return max(8, 32 // jnp.dtype(dtype).itemsize)


def _pick_tile(n: int, bytes_per_unit: int, budget_bytes: int, multiple: int) -> int:
    """Largest tile along a dim of extent n such that tile * bytes_per_unit fits
    the budget and tile is a multiple of `multiple` (or equals the full extent).
    Never falls back to an over-budget full extent unless n < multiple (where
    the full extent is the only legal block size)."""
    if n * bytes_per_unit <= budget_bytes:
        return n                                   # whole extent fits
    if n <= multiple:
        return n                                   # only legal option
    t = (budget_bytes // bytes_per_unit) // multiple * multiple
    return max(t, multiple)                        # hard floor at min legal tile


def _vmem_limit_bytes(*block_nbytes: int) -> int:
    """Explicit scoped-VMEM request derived from the actual block sizes."""
    total = 2 * sum(block_nbytes)                  # worst-case double buffering
    total = int(total * 1.25) + (1 << 20)          # headroom for internal scratch
    return max(min(total, 48 << 20), 16 << 20)     # <= 48 MiB fits v7x physical


def positional_encoding_forward(x: jnp.ndarray, pe_table: jnp.ndarray) -> jnp.ndarray:
    """x: (N0, S, D); returns x * sqrt(D) + pe_table[:S][None], dtype of x."""
    N0, S, D = x.shape
    scale = float(math.sqrt(D))                    # Python float, NOT traced
    pe = pe_table[:S, :].astype(x.dtype)           # (S, D), match x dtype
    kernel = functools.partial(_pe_kernel, scale)

    itemsize = jnp.dtype(x.dtype).itemsize
    sub = _sublane_multiple(x.dtype)
    cost = pl.CostEstimate(
        flops=2 * x.size,                                           # mul + add / elem
        transcendentals=0,
        bytes_accessed=2 * x.size * itemsize + pe.size * itemsize,  # pe read once
    )

    if D % 128 == 0:
        # Lane-aligned d_model: keep D last, tile (seq, d_model). Batch is the
        # INNERMOST grid axis, so pe's block index repeats between consecutive
        # steps and its DMA is skipped -> pe effectively resident per tile.
        td = _pick_tile(D, sub * itemsize, _BLOCK_BUDGET_BYTES, 128)
        ts = _pick_tile(S, td * itemsize, _BLOCK_BUDGET_BYTES, sub)
        blk = ts * td * itemsize
        return pl.pallas_call(
            kernel,
            out_shape=jax.ShapeDtypeStruct((N0, S, D), x.dtype),
            grid_spec=pltpu.PrefetchScalarGridSpec(
                num_scalar_prefetch=0,
                grid=(pl.cdiv(S, ts), pl.cdiv(D, td), N0),
                in_specs=[
                    pl.BlockSpec((pl.Squeezed(), ts, td),
                                 lambda si, di, b: (b, si, di)),
                    pl.BlockSpec((ts, td), lambda si, di, b: (si, di)),
                ],
                out_specs=pl.BlockSpec((pl.Squeezed(), ts, td),
                                       lambda si, di, b: (b, si, di)),
            ),
            compiler_params=pltpu.CompilerParams(
                dimension_semantics=("parallel", "parallel", "arbitrary"),
                vmem_limit_bytes=_vmem_limit_bytes(blk, blk, blk),
            ),
            cost_estimate=cost,
        )(x, pe)

    # Small d_model (< 128 lanes): flatten (S, D) -> L so stores are full-width
    # lane-dense vst. Tile both L and the batch dim; batch innermost keeps the
    # (1, tl) pe slab resident (DMA skipped) across batch tiles.
    L = S * D
    x2 = x.reshape(N0, L)
    pe2 = pe.reshape(1, L)
    tl = _pick_tile(L, sub * itemsize, _BLOCK_BUDGET_BYTES, 128)
    tb = _pick_tile(N0, tl * itemsize, _BLOCK_BUDGET_BYTES, sub)
    x_blk = tb * tl * itemsize
    pe_blk = tl * itemsize
    out2 = pl.pallas_call(
        kernel,
        out_shape=jax.ShapeDtypeStruct((N0, L), x.dtype),
        grid_spec=pltpu.PrefetchScalarGridSpec(
            num_scalar_prefetch=0,
            grid=(pl.cdiv(L, tl), pl.cdiv(N0, tb)),
            in_specs=[
                pl.BlockSpec((tb, tl), lambda li, bi: (bi, li)),
                pl.BlockSpec((1, tl), lambda li, bi: (0, li)),   # resident slab
            ],
            out_specs=pl.BlockSpec((tb, tl), lambda li, bi: (bi, li)),
        ),
        compiler_params=pltpu.CompilerParams(
            dimension_semantics=("parallel", "arbitrary"),
            vmem_limit_bytes=_vmem_limit_bytes(x_blk, x_blk, pe_blk),
        ),
        cost_estimate=cost,
    )(x2, pe2)
    return out2.reshape(N0, S, D)


if __name__ == "__main__":
    key = jax.random.PRNGKey(0)
    k1, k2 = jax.random.split(key)

    # 1) Small-d_model path (flattened, lane-dense): batch=2, seq=8, d_model=32.
    B, S, D = 2, 8, 32
    pe_tab = build_pe_table(d_model=D, max_len=5000)
    x = jax.random.normal(k1, (B, S, D), dtype=jnp.float32)
    out = jax.block_until_ready(positional_encoding_forward(x, pe_tab))
    ref = x * math.sqrt(D) + pe_tab[None, :S, :]
    assert out.shape == (B, S, D)
    assert jnp.allclose(out, ref, atol=1e-5, rtol=1e-5), "mismatch vs reference (D=32)"

    # 2) Lane-aligned d_model path (batch-inner grid, resident pe): 2x16x128.
    B2, S2, D2 = 2, 16, 128
    pe_tab2 = build_pe_table(d_model=D2, max_len=5000)
    x2 = jax.random.normal(k2, (B2, S2, D2), dtype=jnp.float32)
    out2 = jax.block_until_ready(positional_encoding_forward(x2, pe_tab2))
    ref2 = x2 * math.sqrt(D2) + pe_tab2[None, :S2, :]
    assert out2.shape == (B2, S2, D2)
    assert jnp.allclose(out2, ref2, atol=1e-5, rtol=1e-5), "mismatch vs reference (D=128)"

    print("KERNEL_OK")
</pallas_src>

<mosaic_0001>
module attributes {stable_mosaic.version = 11 : i64} {
  func.func @_pe_kernel(%arg0: i32, %arg1: i32, %arg2: memref<2x256xf32, #tpu.memory_space<vmem>>, %arg3: memref<1x256xf32, #tpu.memory_space<vmem>>, %arg4: memref<2x256xf32, #tpu.memory_space<vmem>>) attributes {dimension_semantics = [#tpu.dimension_semantics<parallel>, #tpu.dimension_semantics<arbitrary>], iteration_bounds = array<i64: 1, 1>, scalar_prefetch = 0 : i64, scratch_operands = 0 : i64, tpu.core_type = #tpu.core_type<tc>, window_params = [{transform_indices = @transform_0, window_bounds = array<i64: 2, 256>}, {transform_indices = @transform_1, window_bounds = array<i64: 1, 256>}, {transform_indices = @transform_2, window_bounds = array<i64: 2, 256>}]} {
    %c0 = arith.constant 0 : index
    %c0_0 = arith.constant 0 : index
    %0 = vector.load %arg2[%c0, %c0_0] : memref<2x256xf32, #tpu.memory_space<vmem>>, vector<2x256xf32>
    %cst = arith.constant 5.65685415 : f32
    %1 = vector.broadcast %cst : f32 to vector<2x256xf32>
    %2 = arith.mulf %0, %1 : vector<2x256xf32>
    %c0_1 = arith.constant 0 : index
    %c0_2 = arith.constant 0 : index
    %3 = vector.load %arg3[%c0_1, %c0_2] : memref<1x256xf32, #tpu.memory_space<vmem>>, vector<1x256xf32>
    %4 = vector.broadcast %3 : vector<1x256xf32> to vector<2x256xf32>
    %5 = arith.addf %2, %4 : vector<2x256xf32>
    %c0_3 = arith.constant 0 : index
    %c0_4 = arith.constant 0 : index
    %6 = vector.load %arg4[%c0_3, %c0_4] : memref<2x256xf32, #tpu.memory_space<vmem>>, vector<2x256xf32>
    tpu.vector_store %arg4[%c0_3, %c0_4], %5 {strides = array<i32>} : memref<2x256xf32, #tpu.memory_space<vmem>>, vector<2x256xf32>,
    return
  }
  func.func @transform_0(%arg0: i32, %arg1: i32) -> (i32, i32) {
    %c0_i32 = arith.constant 0 : i32
    return %arg1, %arg0 : i32, i32
  }
  func.func @transform_1(%arg0: i32, %arg1: i32) -> (i32, i32) {
    %c0_i32 = arith.constant 0 : i32
    %c0_i32_0 = arith.constant 0 : i32
    return %c0_i32, %arg0 : i32, i32
  }
  func.func @transform_2(%arg0: i32, %arg1: i32) -> (i32, i32) {
    %c0_i32 = arith.constant 0 : i32
    return %arg1, %arg0 : i32, i32
  }
}

</mosaic_0001>

<bundles_post_ra>
// kernel: tpu_custom_call.1
= control target key start
LH: loop header
LB: loop body
LE: loop exit
PB: predicated region body
PF: predicated region fallthrough
CT: control target
= control target key end

     0   :  { %7 = vsyncpa [#allocation3], 0  ;;  %s158_s0 = inlined_call_operand.hbm [shape: f32[2,256], index: 0, kind: input, shape index: {}]   ;;  %s159_s1 = inlined_call_operand.vmem [shape: f32[1,256], index: 1, kind: input, shape index: {}]   ;;  %s160_s2 = inlined_call_operand.hbm [shape: f32[2,256], index: 2, kind: output, shape index: {}]  }
   0x1   :  { %8 = vsyncpa [#allocation4], 0  ;;  %s113_s9 = smov [#allocation2]   ;;  %s65_s13 = scalar_lea.hbm %s158_s0, 64 }
   0x2   :  { %s15_s10 = sshll.u32 %s113_s9, 4  ;;  %p66_p0 = scmp.ne.s32.totalorder %s158_s0, %s65_s13  ;;  %s16_s10 = int_to_ptr.vmem [resolvable:$true] %s15_s10 }
   0x3   :  { %p69_p1 = scmp.lt.u32.totalorder %s65_s13, %s158_s0 }
   0x5   :  { %p71_p2 = pnand %p69_p1, %p66_p0 }
   0x7   :  { %74 = shalt.err (!%p71_p2)
}
   0x8   :  { %s75_s18 = scalar_lea.vmem %s16_s10, 64  ;;  %p80_p4 = scmp.lt.s32.totalorder %s16_s10, %s16_s10 }
   0x9   :  { %p76_p3 = scmp.ne.s32.totalorder %s16_s10, %s75_s18  ;;  %p81_p5 = scmp.lt.s32.totalorder %s75_s18, %s75_s18 }
   0xb   :  { %p82_p6 = por %p81_p5, %p80_p4 }
   0xd   :  { %p83_p7 = pnand %p82_p6, %p76_p3 }
   0xf   :  { %86 = shalt.err (!%p83_p7)
}
  0x10   :  { %18 = dma.hbm_to_vmem [thread:$0]  %s158_s0, 64, %s16_s10, [#allocation3]  }
  0x11   :  { %109 = dma.done.wait [#allocation3], 64  }
  0x12   :  { %110 = vsyncadd [#allocation3], 4294967232  ;;  %v28_v0 = vlaneseq  ;;  %v114_v1 = vmov 1983009808   ;;  %v24_v7 = vld [vmem:[#allocation2] sm:$0xf] }
  0x13   :  { %v38_v2 = vunpack.c.l.s4 %v114_v1  ;;  %v26_v8 = vld [vmem:[%s159_s1] sm:$0x3]  ;;  %v25_v12 = vmul.f32 5.656854, %v24_v7  ;;  %s115_s0 = smov [#allocation5]  }
  0x14   :  { %v29_v3 = vshrl.u32 %v28_v0, 7  ;;  %s53_s23 = sshll.u32 %s115_s0, 4  ;;  %s54_s23 = int_to_ptr.vmem [resolvable:$true] %s53_s23 }
  0x15   :  { %v39_v6 = vunpack.c.0.s8 %v38_v2  ;;  %s87_s24 = scalar_lea.vmem %s54_s23, 64  ;;  %p92_p9 = scmp.lt.s32.totalorder %s54_s23, %s54_s23 }
  0x16   :  { %v30_v4 = vsub.s32 0, %v29_v3  ;;  %v34_v5 = vsub.s32 1, %v29_v3  ;;  %p88_p8 = scmp.ne.s32.totalorder %s54_s23, %s87_s24  ;;  %p93_p10 = scmp.lt.s32.totalorder %s87_s24, %s87_s24 }
  0x17   :  { %v42_v11 = vsub.s32 %v39_v6, %v29_v3 }
  0x18   :  { %v31_v9 = vrot.slane %v26_v8, %v30_v4  ;;  %v35_v10 = vrot.slane %v26_v8, %v34_v5  ;;  %p94_p11 = por %p93_p10, %p92_p9 }
  0x1a   :  { %v36_v13 = vcombine.low %v31_v9, %v35_v10  ;;  %p95_p12 = pnand %p94_p11, %p88_p8 }
  0x1c   :  { %v43_v14 = vrot.slane %v36_v13, %v42_v11 }
  0x1e   :  { %v45_v15 = vadd.f32 %v43_v14, %v25_v12 }
  0x20   :  { %46 = vst [vmem:[#allocation5] sm:$0xf] %v45_v15 }
  0x21   :  { %98 = shalt.err (!%p95_p12)
}
  0x22   :  { %s99_s26 = scalar_lea.hbm %s160_s2, 64 }
  0x23   :  { %p100_p13 = scmp.ne.s32.totalorder %s160_s2, %s99_s26  ;;  %p103_p0 = scmp.lt.u32.totalorder %s99_s26, %s160_s2 }
  0x25   :  { %p105_p1 = pnand %p103_p0, %p100_p13 }
  0x27   :  { %108 = shalt.err (!%p105_p1)
}
  0x28   :  { %56 = dma.vmem_to_hbm [thread:$0]  %s54_s23, 64, %s160_s2, [#allocation4]  }
  0x29   :  { %111 = dma.done.wait [#allocation4], 64  }
  0x2a   :  { %112 = vsyncadd [#allocation4], 4294967232 }
  0x2b   :  { %60 = vsyncpa [#allocation3], 1 }
  0x2c   :  { %61 = vsyncpa [#allocation4], 1 }

</bundles_post_ra>
